<compile_context>
chip_gen: v6e
topology: v6e:2x2x1
jax: 0.10.0
libtpu: 0.0.40
codegen_flags: <defaults>
</compile_context>

<pallas_src>
import jax
import jax.numpy as jnp
from jax import lax
from jax.experimental import pallas as pl
from jax.experimental.pallas import tpu as pltpu

# ----------------------------- config -------------------------------------
NUM_EMBEDDINGS = 64      # V
EMBEDDING_DIM = 128      # D (lane-aligned: multiple of 128)
PADDING_IDX = 0
DROPOUT_P = 0.0          # module default; p=0 -> identity
MAX_TILE = 2048          # max rows of output produced per grid step


def _round_up(x, m):
    return ((x + m - 1) // m) * m


# --------------------------- Pallas kernel --------------------------------
def embedding_kernel(idx_ref, w_ref, o_ref):
    """One-hot MXU gather of `tile` embedding rows per grid step.

    idx_ref : VMEM (tile, 1) int32  -- flat indices for this tile
    w_ref   : VMEM (V, D)           -- full embedding table (resident, single-buffered)
    o_ref   : VMEM (tile, D)        -- output slab
    """
    tile = idx_ref.shape[0]
    v = w_ref.shape[0]
    idx = idx_ref[...]                                        # (tile, 1)
    col = lax.broadcasted_iota(jnp.int32, (tile, v), 1)       # (tile, V)
    one_hot = (col == idx).astype(jnp.float32)                # (tile, V), 0/1 exact
    # HIGHEST precision -> the one-hot matmul reproduces the f32 table rows
    # exactly (gather is not rounded through default bf16 MXU passes).
    o_ref[...] = jnp.dot(
        one_hot, w_ref[...],
        preferred_element_type=jnp.float32,
        precision=lax.Precision.HIGHEST,
    ).astype(o_ref.dtype)


def embedding_lookup(indices, weight, max_tile=MAX_TILE):
    """indices: (B, S) int -> (B, S, D) gathered from weight (V, D)."""
    B, S = indices.shape
    V, D = weight.shape
    N = B * S

    # Tile sizing: as big as useful (amortize per-step overhead, stay HBM-bound)
    # but no bigger than the problem; sublane-aligned (multiple of 8).
    tile = min(max_tile, _round_up(N, 8))
    num_tiles = pl.cdiv(N, tile)

    # Pad ONLY the cheap 4-byte/row index array so every index block read is
    # in-bounds; the (N, D) output itself is never padded or re-sliced.
    flat_idx = indices.reshape(N).astype(jnp.int32)
    n_idx = num_tiles * tile
    if n_idx != N:
        flat_idx = jnp.pad(flat_idx, (0, n_idx - N),
                           constant_values=PADDING_IDX)
    idx2d = flat_idx.reshape(n_idx, 1)

    out = pl.pallas_call(
        embedding_kernel,
        out_shape=jax.ShapeDtypeStruct((N, D), weight.dtype),
        grid=(num_tiles,),
        in_specs=[
            # per-tile indices: contiguous HBM read, sublane-aligned block
            pl.BlockSpec((tile, 1), lambda i: (i, 0)),
            # resident table: constant index_map + single buffer (fetched once)
            pl.BlockSpec((V, D), lambda i: (0, 0),
                         pipeline_mode=pl.Buffered(1)),
        ],
        # ragged last block (if N % tile != 0) is masked by Pallas on write
        out_specs=pl.BlockSpec((tile, D), lambda i: (i, 0)),
        compiler_params=pltpu.CompilerParams(
            dimension_semantics=("parallel",),
        ),
    )(idx2d, weight)

    return out.reshape(B, S, D)


# --------------------------- module wrapper --------------------------------
def make_embedding_params(key, num_embeddings, embedding_dim, padding_idx):
    # init_wt_unif-style small uniform init.
    w = jax.random.uniform(
        key, (num_embeddings, embedding_dim),
        dtype=jnp.float32, minval=-0.02, maxval=0.02)
    # nn.Embedding zeroes the padding_idx row.
    w = w.at[padding_idx].set(0.0)
    return w


def my_embedding_forward(x, weight, dropout_p=DROPOUT_P):
    y = embedding_lookup(x, weight)
    # Dropout with p=0 is the identity (also identity in eval mode).
    # TODO(synk): training-mode dropout via pltpu.prng_seed/prng_random_bits if p > 0.
    return y


# ------------------------------- main ---------------------------------------
if __name__ == "__main__":
    key = jax.random.PRNGKey(0)
    k_w, k_x = jax.random.split(key)

    weight = make_embedding_params(k_w, NUM_EMBEDDINGS, EMBEDDING_DIM,
                                   PADDING_IDX)

    B, S = 2, 8
    x = jax.random.randint(k_x, (B, S), 0, NUM_EMBEDDINGS, dtype=jnp.int32)

    out = my_embedding_forward(x, weight)
    out = jax.block_until_ready(out)

    # sanity check against pure-JAX reference gather
    ref = weight[x]
    assert out.shape == (B, S, EMBEDDING_DIM)
    assert jnp.allclose(out, ref, rtol=1e-6, atol=1e-7), \
        "mismatch vs reference gather"

    print("KERNEL_OK")
</pallas_src>

<mosaic_0001>
module attributes {stable_mosaic.version = 11 : i64} {
  func.func @embedding_kernel(%arg0: i32, %arg1: memref<16x1xi32, #tpu.memory_space<vmem>>, %arg2: memref<64x128xf32, #tpu.memory_space<vmem>>, %arg3: memref<16x128xf32, #tpu.memory_space<vmem>>) attributes {dimension_semantics = [#tpu.dimension_semantics<parallel>], iteration_bounds = array<i64: 1>, scalar_prefetch = 0 : i64, scratch_operands = 0 : i64, tpu.core_type = #tpu.core_type<tc>, window_params = [{transform_indices = @transform_0, window_bounds = array<i64: 16, 1>}, {pipeline_mode = #tpu.pipeline_mode<synchronous>, transform_indices = @transform_1, window_bounds = array<i64: 64, 128>}, {transform_indices = @transform_2, window_bounds = array<i64: 16, 128>}]} {
    %c0 = arith.constant 0 : index
    %c0_0 = arith.constant 0 : index
    %0 = vector.load %arg1[%c0, %c0_0] : memref<16x1xi32, #tpu.memory_space<vmem>>, vector<16x1xi32>
    %1 = tpu.iota {dimensions = array<i32: 1>} : vector<16x64xi32>
    %2 = vector.broadcast %0 : vector<16x1xi32> to vector<16x64xi32>
    %3 = arith.cmpi eq, %1, %2 : vector<16x64xi32>
    %4 = arith.extui %3 : vector<16x64xi1> to vector<16x64xi32>
    %5 = arith.sitofp %4 : vector<16x64xi32> to vector<16x64xf32>
    %c0_1 = arith.constant 0 : index
    %c0_2 = arith.constant 0 : index
    %6 = vector.load %arg2[%c0_1, %c0_2] : memref<64x128xf32, #tpu.memory_space<vmem>>, vector<64x128xf32>
    %cst = arith.constant dense<0.000000e+00> : vector<16x128xf32>
    %7 = tpu.matmul %5, %6, %cst {dimension_numbers = #tpu.dot_dimension_numbers<[1], [0], [0], [1], [0, 0, 1, 1], [], []>, precision = #tpu.contract_precision<fp32>} : vector<16x64xf32>, vector<64x128xf32>, vector<16x128xf32> -> vector<16x128xf32>
    %c0_3 = arith.constant 0 : index
    %c0_4 = arith.constant 0 : index
    %8 = vector.load %arg3[%c0_3, %c0_4] : memref<16x128xf32, #tpu.memory_space<vmem>>, vector<16x128xf32>
    tpu.vector_store %arg3[%c0_3, %c0_4], %7 {strides = array<i32>} : memref<16x128xf32, #tpu.memory_space<vmem>>, vector<16x128xf32>,
    return
  }
  func.func @transform_0(%arg0: i32) -> (i32, i32) {
    %c0_i32 = arith.constant 0 : i32
    %c0_i32_0 = arith.constant 0 : i32
    return %arg0, %c0_i32 : i32, i32
  }
  func.func @transform_1(%arg0: i32) -> (i32, i32) {
    %c0_i32 = arith.constant 0 : i32
    %c0_i32_0 = arith.constant 0 : i32
    %c0_i32_1 = arith.constant 0 : i32
    return %c0_i32, %c0_i32_0 : i32, i32
  }
  func.func @transform_2(%arg0: i32) -> (i32, i32) {
    %c0_i32 = arith.constant 0 : i32
    %c0_i32_0 = arith.constant 0 : i32
    return %arg0, %c0_i32 : i32, i32
  }
}

</mosaic_0001>

<bundles_post_ra>
// kernel: tpu_custom_call.1
= control target key start
LH: loop header
LB: loop body
LE: loop exit
PB: predicated region body
PF: predicated region fallthrough
CT: control target
= control target key end

     0   :  { %7 = vsyncpa [#allocation3], 0  ;;  %s1108_s0 = inlined_call_operand.vmem [shape: s32[16,1], index: 0, kind: input, shape index: {}]   ;;  %s1109_s1 = inlined_call_operand.hbm [shape: f32[64,128], index: 1, kind: input, shape index: {}]   ;;  %s1110_s2 = inlined_call_operand.hbm [shape: f32[16,128], index: 2, kind: output, shape index: {}]  }
   0x1   :  { %8 = vsyncpa [#allocation4], 0  ;;  %s889_s9 = smov [#allocation2]  }
   0x2   :  { %s16_s10 = sshll.u32 %s889_s9, 4  ;;  %s17_s10 = int_to_ptr.vmem [resolvable:$true] %s16_s10 }
   0x3   :  { %s853_s11 = scalar_lea.vmem %s17_s10, 1024  ;;  %p858_p1 = scmp.lt.s32.totalorder %s17_s10, %s17_s10 }
   0x4   :  { %p854_p0 = scmp.ne.s32.totalorder %s17_s10, %s853_s11  ;;  %p859_p2 = scmp.lt.s32.totalorder %s853_s11, %s853_s11 }
   0x6   :  { %p860_p3 = por %p859_p2, %p858_p1 }
   0x8   :  { %p861_p4 = pnand %p860_p3, %p854_p0 }
   0xa   :  { %864 = shalt.err (!%p861_p4)
}
   0xb   :  { %s890_s12 = smov 128   ;;  %s891_s13 = smov 8  }
   0xc   :  { %22 = dma.hbm_to_vmem [thread:$0]  %s1109_s1, 1024, %s17_s10, [#allocation3], %s890_s12, %s890_s12, %s891_s13  }
   0xd   :  { %885 = dma.done.wait [#allocation3], 1024  }
   0xe   :  { %886 = vsyncadd [#allocation3], 4294966272  ;;  %v892_v0 = vmov 0   ;;  %v26_v1 = vld [vmem:[%s1108_s0] sm:$0xff]  ;;  %v27_v2 = vld [vmem:[%s1108_s0 + $0x8] sm:$0xff]  ;;  %v28_v51 = vlaneseq  ;;  %vm50_vm0 = vcmask 523264  }
   0xf   :  { %844 = vset.pattern.permute.xlu0 %v892_v0  ;;  %v49_v3 = vld [vmem:[#allocation2 + $0x38] sm:$0xff]  ;;  %v48_v5 = vld [vmem:[#allocation2 + $0x30] sm:$0xff]  ;;  %v47_v6 = vld [vmem:[#allocation2 + $0x28] sm:$0xff]  ;;  %v893_v54 = vmov 0.0   ;;  %s894_s0 = smov [#allocation5]  }
  0x10   :  { %31 = vperm.xlu0 %844, %v26_v1   ;;  %v922_v4 = vand.u32 4294901760, %v49_v3  ;;  %v46_v7 = vld [vmem:[#allocation2 + $0x20] sm:$0xff]  ;;  %v924_v8 = vand.u32 4294901760, %v48_v5  ;;  %v926_v9 = vand.u32 4294901760, %v47_v6  ;;  %v45_v11 = vld [vmem:[#allocation2 + $0x18] sm:$0xff]  ;;  %v44_v12 = vld [vmem:[#allocation2 + $0x10] sm:$0xff] }
  0x11   :  { %v928_v10 = vand.u32 4294901760, %v46_v7  ;;  %v43_v13 = vld [vmem:[#allocation2 + $0x8] sm:$0xff]  ;;  %v933_v15 = vand.u32 4294901760, %v45_v11  ;;  %v936_v16 = vand.u32 4294901760, %v44_v12  ;;  %v42_v18 = vld [vmem:[#allocation2] sm:$0xff]  ;;  %v29_v52 = vand.u32 127, %v28_v51 }
  0x12   :  { %v931_v14 = vsub.f32 %v49_v3, %v922_v4  ;;  %724 = vmatprep.subr.mxu0 %v922_v4  ;;  %v938_v17 = vand.u32 4294901760, %v43_v13  ;;  %v941_v19 = vsub.f32 %v48_v5, %v924_v8  ;;  %v944_v20 = vsub.f32 %v47_v6, %v926_v9  ;;  %s644_s1 = sshll.u32 %s894_s0, 4  ;;  %s645_s1 = int_to_ptr.vmem [resolvable:$true] %s644_s1 }
  0x13   :  { %v947_v21 = vsub.f32 %v46_v7, %v928_v10  ;;  %725 = vmatpush3.msra.mxu0 %v922_v4  ;;  %v954_v23 = vsub.f32 %v45_v11, %v933_v15  ;;  %v957_v24 = vsub.f32 %v44_v12, %v936_v16  ;;  %v960_v25 = vand.u32 4294901760, %v42_v18  ;;  %s865_s20 = scalar_lea.vmem %s645_s1, 256  ;;  %p870_p6 = scmp.lt.s32.totalorder %s645_s1, %s645_s1 }
  0x14   :  { %34 = vperm.xlu0 %844, %v27_v2   ;;  %v951_v22 = vand.u32 4294901760, %v931_v14  ;;  %726 = vmatprep.subr.mxu0 %v924_v8  ;;  %v963_v26 = vand.u32 4294901760, %v941_v19  ;;  %v966_v27 = vand.u32 4294901760, %v944_v20  ;;  %v978_v31 = vsub.f32 %v43_v13, %v938_v17  ;;  %p866_p5 = scmp.ne.s32.totalorder %s645_s1, %s865_s20  ;;  %p871_p7 = scmp.lt.s32.totalorder %s865_s20, %s865_s20 }
  0x15   :  { %v969_v28 = vand.u32 4294901760, %v947_v21  ;;  %727 = vmatpush3.msra.mxu0 %v924_v8  ;;  %v975_v30 = vand.u32 4294901760, %v954_v23  ;;  %v989_v36 = vand.u32 4294901760, %v957_v24  ;;  %v992_v37 = vsub.f32 %v42_v18, %v960_v25 }
  0x16   :  { %v170_v29 = vsub.f32 %v931_v14, %v951_v22  ;;  %728 = vmatprep.subr.mxu0 %v926_v9  ;;  %v177_v32 = vsub.f32 %v941_v19, %v963_v26  ;;  %v184_v33 = vsub.f32 %v944_v20, %v966_v27  ;;  %v999_v41 = vand.u32 4294901760, %v978_v31  ;;  %p872_p8 = por %p871_p7, %p870_p6 }
  0x17   :  { %729 = vmatpush3.msra.mxu0 %v926_v9  ;;  %v191_v35 = vsub.f32 %v947_v21, %v969_v28  ;;  %v198_v40 = vsub.f32 %v954_v23, %v975_v30  ;;  %v205_v43 = vsub.f32 %v957_v24, %v989_v36  ;;  %v1006_v44 = vand.u32 4294901760, %v992_v37 }
  0x18   :  { %v171_v34 = vand.u32 4294901760, %v170_v29  ;;  %730 = vmatprep.subr.mxu0 %v928_v10  ;;  %v178_v38 = vand.u32 4294901760, %v177_v32  ;;  %v185_v39 = vand.u32 4294901760, %v184_v33  ;;  %v212_v46 = vsub.f32 %v978_v31, %v999_v41  ;;  %p873_p9 = pnand %p872_p8, %p866_p5 }
  0x19   :  { %731 = vmatpush3.msra.mxu0 %v928_v10  ;;  %v192_v42 = vand.u32 4294901760, %v191_v35  ;;  %v199_v45 = vand.u32 4294901760, %v198_v40  ;;  %v206_v47 = vand.u32 4294901760, %v205_v43  ;;  %v219_v48 = vsub.f32 %v992_v37, %v1006_v44 }
  0x1a   :  { %743 = vmatprep.subr.mxu1 %v171_v34  ;;  %732 = vmatprep.subr.mxu0 %v933_v15  ;;  %v213_v49 = vand.u32 4294901760, %v212_v46 }
  0x1b   :  { %744 = vmatpush3.msra.mxu1 %v171_v34  ;;  %733 = vmatpush3.msra.mxu0 %v933_v15  ;;  %v220_v50 = vand.u32 4294901760, %v219_v48 }
  0x1c   :  { %745 = vmatprep.subr.mxu1 %v178_v38  ;;  %734 = vmatprep.subr.mxu0 %v936_v16 }
  0x1d   :  { %746 = vmatpush3.msra.mxu1 %v178_v38  ;;  %735 = vmatpush3.msra.mxu0 %v936_v16 }
  0x1e   :  { %747 = vmatprep.subr.mxu1 %v185_v39  ;;  %736 = vmatprep.subr.mxu0 %v938_v17 }
  0x1f   :  { %748 = vmatpush3.msra.mxu1 %v185_v39  ;;  %737 = vmatpush3.msra.mxu0 %v938_v17 }
  0x20   :  { %749 = vmatprep.subr.mxu1 %v192_v42  ;;  %738 = vmatprep.subr.mxu0 %v960_v25 }
  0x21   :  { %750 = vmatpush3.msra.mxu1 %v192_v42  ;;  %739 = vmatpush3.msra.mxu0 %v960_v25 }
  0x22   :  { %751 = vmatprep.subr.mxu1 %v199_v45  ;;  %762 = vmatprep.subr.mxu0 %v931_v14 }
  0x23   :  { %752 = vmatpush3.msra.mxu1 %v199_v45 }
  0x24   :  { %753 = vmatprep.subr.mxu1 %v206_v47 }
  0x25   :  { %754 = vmatpush3.msra.mxu1 %v206_v47 }
  0x26   :  { %755 = vmatprep.subr.mxu1 %v213_v49 }
  0x27   :  { %756 = vmatpush3.msra.mxu1 %v213_v49 }
  0x28   :  { %757 = vmatprep.subr.mxu1 %v220_v50 }
  0x29   :  { %758 = vmatpush3.msra.mxu1 %v220_v50 }
  0x2a   :  { %781 = vmatprep.subr.mxu1 %v922_v4 }
  0x8b   :  { %v32_v53 = vpop.permute.xlu0 %31 }
  0x8c   :  { %vm36_vm1 = vcmp.eq.s32.totalorder %v29_v52, %v32_v53 }
  0x8d   :  { %v1020_v55 = vsel %vm36_vm1, 1.0, %v893_v54 }
  0x8e   :  { %v52_v56 = vsel %vm50_vm0, %v1020_v55, 0  ;;  %759 = vmatprep.mubr.msk.f32.mxu1 %vm50_vm0, %v1020_v55 }
  0x8f   :  { %v131_v57 = vsub.f32 %v52_v56, %v52_v56  ;;  %v35_v58 = vpop.permute.xlu0 %34 }
  0x90   :  { %vm37_vm2 = vcmp.eq.s32.totalorder %v29_v52, %v35_v58 }
  0x91   :  { %v1026_v59 = vsel %vm37_vm2, 1.0, %v893_v54  ;;  %v132_v60 = vand.u32 4294901760, %v131_v57 }
  0x92   :  { %v55_v61 = vsel %vm50_vm0, %v1026_v59, 0  ;;  %760 = vmatmul.mubr.msk.f32.vlgmr.msra.gmra.mxu1 %vm50_vm0, %v1026_v59 }
  0x93   :  { %v141_v62 = vsub.f32 %v55_v61, %v55_v61  ;;  %782 = vmatpush3.msra.mxu1 %v922_v4  ;;  %797 = vmatprep.mubr.f32.mxu1 %v132_v60  ;;  %v133_v63 = vsub.f32 %v131_v57, %v132_v60 }
  0x94   :  { %783 = vmatprep.subr.mxu1 %v924_v8 }
  0x95   :  { %784 = vmatpush3.msra.mxu1 %v924_v8  ;;  %v134_v0 = vand.u32 4294901760, %v133_v63  ;;  %v142_v1 = vand.u32 4294901760, %v141_v62 }
  0x96   :  { %785 = vmatprep.subr.mxu1 %v926_v9 }
  0x97   :  { %786 = vmatpush3.msra.mxu1 %v926_v9  ;;  %740 = vmatprep.mubr.f32.mxu0 %v134_v0  ;;  %v143_v2 = vsub.f32 %v141_v62, %v142_v1 }
  0x98   :  { %787 = vmatprep.subr.mxu1 %v928_v10 }
  0x99   :  { %788 = vmatpush3.msra.mxu1 %v928_v10  ;;  %v144_v3 = vand.u32 4294901760, %v143_v2 }
  0x9a   :  { %789 = vmatprep.subr.mxu1 %v933_v15 }
  0x9b   :  { %790 = vmatpush3.msra.mxu1 %v933_v15  ;;  %741 = vmatmul.mubr.f32.vlgmr.msra.gmra.mxu0 %v144_v3 }
  0x9c   :  { %763 = vmatpush3.msra.mxu0 %v931_v14  ;;  %791 = vmatprep.subr.mxu1 %v936_v16 }
  0x9d   :  { %764 = vmatprep.subr.mxu0 %v941_v19  ;;  %778 = vmatprep.mubr.f32.mxu0 %v131_v57 }
  0x9e   :  { %792 = vmatpush3.msra.mxu1 %v936_v16  ;;  %765 = vmatpush3.msra.mxu0 %v941_v19 }
  0x9f   :  { %793 = vmatprep.subr.mxu1 %v938_v17  ;;  %766 = vmatprep.subr.mxu0 %v944_v20 }
  0xa0   :  { %794 = vmatpush3.msra.mxu1 %v938_v17  ;;  %767 = vmatpush3.msra.mxu0 %v944_v20 }
  0xa1   :  { %795 = vmatprep.subr.mxu1 %v960_v25  ;;  %768 = vmatprep.subr.mxu0 %v947_v21 }
  0xa2   :  { %796 = vmatpush3.msra.mxu1 %v960_v25  ;;  %769 = vmatpush3.msra.mxu0 %v947_v21 }
  0xa3   :  { %798 = vmatmul.mubr.f32.vlgmr.msra.gmra.mxu1 %v142_v1  ;;  %819 = vmatprep.subr.mxu1 %v922_v4 }
  0xa4   :  { %770 = vmatprep.subr.mxu0 %v954_v23  ;;  %820 = vmatpush3.msra.mxu1 %v922_v4 }
  0xa5   :  { %835 = vmatprep.mubr.msk.f32.mxu1 %vm50_vm0, %v1020_v55  ;;  %771 = vmatpush3.msra.mxu0 %v954_v23 }
  0xa6   :  { %821 = vmatprep.subr.mxu1 %v924_v8  ;;  %772 = vmatprep.subr.mxu0 %v957_v24 }
  0xa7   :  { %822 = vmatpush3.msra.mxu1 %v924_v8  ;;  %773 = vmatpush3.msra.mxu0 %v957_v24 }
  0xa8   :  { %823 = vmatprep.subr.mxu1 %v926_v9  ;;  %774 = vmatprep.subr.mxu0 %v978_v31 }
  0xa9   :  { %824 = vmatpush3.msra.mxu1 %v926_v9  ;;  %775 = vmatpush3.msra.mxu0 %v978_v31 }
  0xaa   :  { %825 = vmatprep.subr.mxu1 %v928_v10  ;;  %776 = vmatprep.subr.mxu0 %v992_v37 }
  0xab   :  { %826 = vmatpush3.msra.mxu1 %v928_v10  ;;  %777 = vmatpush3.msra.mxu0 %v992_v37 }
  0xac   :  { %827 = vmatprep.subr.mxu1 %v933_v15  ;;  %779 = vmatmul.mubr.f32.vlgmr.msra.gmra.mxu0 %v141_v62 }
  0xad   :  { %800 = vmatprep.subr.mxu0 %v951_v22  ;;  %828 = vmatpush3.msra.mxu1 %v933_v15 }
  0xae   :  { %801 = vmatpush3.msra.mxu0 %v951_v22  ;;  %816 = vmatprep.mubr.msk.f32.mxu0 %vm50_vm0, %v1020_v55 }
  0xaf   :  { %829 = vmatprep.subr.mxu1 %v936_v16  ;;  %802 = vmatprep.subr.mxu0 %v963_v26 }
  0xb0   :  { %830 = vmatpush3.msra.mxu1 %v936_v16  ;;  %803 = vmatpush3.msra.mxu0 %v963_v26 }
  0xb1   :  { %831 = vmatprep.subr.mxu1 %v938_v17  ;;  %804 = vmatprep.subr.mxu0 %v966_v27 }
  0xb2   :  { %832 = vmatpush3.msra.mxu1 %v938_v17  ;;  %805 = vmatpush3.msra.mxu0 %v966_v27 }
  0xb3   :  { %833 = vmatprep.subr.mxu1 %v960_v25  ;;  %806 = vmatprep.subr.mxu0 %v969_v28 }
  0xb4   :  { %834 = vmatpush3.msra.mxu1 %v960_v25  ;;  %807 = vmatpush3.msra.mxu0 %v969_v28 }
  0xb5   :  { %836 = vmatmul.mubr.msk.f32.vlgmr.msra.gmra.mxu1 %vm50_vm0, %v1026_v59  ;;  %808 = vmatprep.subr.mxu0 %v975_v30 }
  0xb6   :  { %809 = vmatpush3.msra.mxu0 %v975_v30 }
  0xb7   :  { %810 = vmatprep.subr.mxu0 %v989_v36 }
  0xb8   :  { %811 = vmatpush3.msra.mxu0 %v989_v36 }
  0xb9   :  { %812 = vmatprep.subr.mxu0 %v999_v41 }
  0xba   :  { %813 = vmatpush3.msra.mxu0 %v999_v41 }
  0xbb   :  { %814 = vmatprep.subr.mxu0 %v1006_v44 }
  0xbc   :  { %815 = vmatpush3.msra.mxu0 %v1006_v44 }
  0xbd   :  { %817 = vmatmul.mubr.msk.f32.vlgmr.msra.gmra.mxu0 %vm50_vm0, %v1026_v59 }
 0x152   :  { %v761_v5 = vpop.f32.mrf.mxu1 }
 0x154   :  { %v257_v8 = vpop.f32.mrf.mxu1 }
 0x15b   :  { %v742_v4 = vpop.f32.mrf.mxu0 }
 0x15c   :  { %v264_v9 = vadd.f32 %v761_v5, %v742_v4 }
 0x15d   :  { %v136_v6 = vpop.f32.mrf.mxu0 }
 0x15e   :  { %v258_v12 = vadd.f32 %v257_v8, %v136_v6 }
 0x163   :  { %v799_v10 = vpop.f32.mrf.mxu1 }
 0x165   :  { %v439_v15 = vpop.f32.mrf.mxu1 }
 0x16c   :  { %v780_v7 = vpop.f32.mrf.mxu0 }
 0x16d   :  { %v359_v13 = vadd.f32 %v780_v7, %v264_v9 }
 0x16e   :  { %v351_v11 = vpop.f32.mrf.mxu0 }
 0x16f   :  { %v352_v14 = vadd.f32 %v351_v11, %v258_v12  ;;  %v448_v16 = vadd.f32 %v799_v10, %v359_v13 }
 0x171   :  { %v440_v20 = vadd.f32 %v439_v15, %v352_v14 }
 0x175   :  { %v837_v17 = vpop.f32.mrf.mxu1 }
 0x177   :  { %v627_v24 = vpop.f32.mrf.mxu1 }
 0x17d   :  { %v818_v18 = vpop.f32.mrf.mxu0 }
 0x17e   :  { %v549_v19 = vadd.f32 %v818_v18, %v448_v16 }
 0x17f   :  { %v542_v21 = vpop.f32.mrf.mxu0 }
 0x180   :  { %v634_v22 = vadd.f32 %v837_v17, %v549_v19  ;;  %v543_v23 = vadd.f32 %v542_v21, %v440_v20 }
 0x182   :  { %638 = vst [vmem:[#allocation5 + $0x8] sm:$0xff] %v634_v22  ;;  %v628_v25 = vadd.f32 %v627_v24, %v543_v23 }
 0x184   :  { %637 = vst [vmem:[#allocation5] sm:$0xff] %v628_v25 }
 0x185   :  { %876 = shalt.err (!%p873_p9)
}
 0x186   :  { %650 = dma.vmem_to_hbm [thread:$0]  %s645_s1, 256, %s1110_s2, [#allocation4], %s890_s12, %s890_s12, %s891_s13  }
 0x187   :  { %887 = dma.done.wait [#allocation4], 256  }
 0x188   :  { %888 = vsyncadd [#allocation4], 4294967040 }
 0x189   :  { %654 = vsyncpa [#allocation3], 1 }
 0x18a   :  { %655 = vsyncpa [#allocation4], 1 }

</bundles_post_ra>
